<compile_context>
chip_gen: v5e
topology: v5e:2x2
jax: 0.10.0
libtpu: 0.0.40
codegen_flags: <defaults>
</compile_context>

<pallas_src>
import functools

import jax
import jax.numpy as jnp
from jax.experimental import pallas as pl
from jax.experimental.pallas import tpu as pltpu

LANE = 128  # TPU lane width: pad the output feature dim to this for dense stores


def mlp_kernel(x_ref, w1_ref, b1_ref, w2_ref, b2_ref, o_ref):
    # Layer 1: (TB, obs) @ (obs, hidden) on the MXU, f32 accumulation.
    h = jnp.dot(x_ref[...], w1_ref[...], preferred_element_type=jnp.float32)
    h = h + b1_ref[...]            # (1, hidden) broadcasts over the batch tile, f32
    h = jnp.maximum(h, 0.0)        # ReLU in f32 (v5e-safe)
    # Layer 2: cast activation to the matmul dtype, accumulate f32.
    out = jnp.dot(h.astype(w2_ref.dtype), w2_ref[...],
                  preferred_element_type=jnp.float32)
    out = out + b2_ref[...]        # (1, n_out_padded), f32
    o_ref[...] = out.astype(o_ref.dtype)


def _net_forward_padded(x, w1, b1, w2p, b2p, *, tb):
    """x: (padded_batch, obs); weights resident, batch tiled by `tb`."""
    batch, obs = x.shape
    hidden = w1.shape[1]
    n_out = w2p.shape[1]  # already padded to a multiple of LANE
    grid = (batch // tb,)
    return pl.pallas_call(
        mlp_kernel,
        out_shape=jax.ShapeDtypeStruct((batch, n_out), jnp.float32),
        grid_spec=pltpu.PrefetchScalarGridSpec(
            num_scalar_prefetch=0,
            grid=grid,
            in_specs=[
                pl.BlockSpec((tb, obs), lambda i: (i, 0)),       # activations: tiled over batch
                pl.BlockSpec((obs, hidden), lambda i: (0, 0)),   # W1: VMEM-resident
                pl.BlockSpec((1, hidden), lambda i: (0, 0)),     # b1: resident
                pl.BlockSpec((hidden, n_out), lambda i: (0, 0)), # W2 (lane-padded): resident
                pl.BlockSpec((1, n_out), lambda i: (0, 0)),      # b2 (lane-padded): resident
            ],
            out_specs=pl.BlockSpec((tb, n_out), lambda i: (i, 0)),
        ),
        compiler_params=pltpu.CompilerParams(
            dimension_semantics=("parallel",),  # free ~2x on v7x dual TC; no-op elsewhere
        ),
    )(x, w1, b1, w2p, b2p)


@functools.partial(jax.jit, static_argnames=("block_batch",))
def net_forward(x, w1, b1, w2, b2, *, block_batch=512):
    """Forward pass of Net. x: (batch, obs) any float dtype; w1/w2 in matmul dtype (bf16),
    b1/b2 in f32. Returns f32 logits of shape (batch, n_action)."""
    batch, obs = x.shape
    hidden = w1.shape[1]
    n_action = w2.shape[1]

    # Lane-dense output: pad the tiny action dim up to a multiple of 128 lanes.
    n_out = max(LANE, ((n_action + LANE - 1) // LANE) * LANE)
    w2p = jnp.zeros((hidden, n_out), w2.dtype).at[:, :n_action].set(w2)
    b2p = jnp.zeros((1, n_out), jnp.float32).at[:, :n_action].set(b2.astype(jnp.float32))

    # Batch tile: multiple of 8 sublanes, capped by the actual batch.
    tb = min(block_batch, batch)
    tb = max(8, (tb // 8) * 8)
    padded = ((batch + tb - 1) // tb) * tb

    xc = x.astype(w1.dtype)  # bf16 matmul operands, f32 accumulate inside the kernel
    if padded != batch:
        xc = jnp.pad(xc, ((0, padded - batch), (0, 0)))

    out = _net_forward_padded(xc, w1, b1.astype(jnp.float32), w2p, b2p, tb=tb)
    return out[:batch, :n_action]


def init_params(key, obs_size, hidden_size, n_action,
                param_dtype=jnp.bfloat16, bias_dtype=jnp.float32):
    """Shapes match nn.Linear params, pre-transposed to [in, out]; PyTorch-style init scale."""
    k1, k2, k3, k4 = jax.random.split(key, 4)
    s1 = 1.0 / jnp.sqrt(obs_size)
    s2 = 1.0 / jnp.sqrt(hidden_size)
    w1 = jax.random.uniform(k1, (obs_size, hidden_size), jnp.float32, -s1, s1).astype(param_dtype)
    b1 = jax.random.uniform(k2, (1, hidden_size), jnp.float32, -s1, s1).astype(bias_dtype)
    w2 = jax.random.uniform(k3, (hidden_size, n_action), jnp.float32, -s2, s2).astype(param_dtype)
    b2 = jax.random.uniform(k4, (1, n_action), jnp.float32, -s2, s2).astype(bias_dtype)
    return w1, b1, w2, b2


if __name__ == "__main__":
    # CartPole-like sizes; batch = many vectorized envs so the MXU actually sees work
    # (review: batch >= 256, multiple of 8).  grid = batch / block_batch = 4 steps.
    batch, obs_size, hidden_size, n_action = 2048, 4, 128, 2

    key = jax.random.PRNGKey(0)
    kx, kp = jax.random.split(key)
    x = jax.random.normal(kx, (batch, obs_size), dtype=jnp.float32)
    w1, b1, w2, b2 = init_params(kp, obs_size, hidden_size, n_action)

    out = net_forward(x, w1, b1, w2, b2)
    out = jax.block_until_ready(out)

    # Pure-JAX reference mirroring the kernel's numerics
    # (bf16 matmul operands, f32 accumulation / bias / ReLU).
    x32 = x.astype(jnp.bfloat16).astype(jnp.float32)
    w1f = w1.astype(jnp.float32)
    w2f = w2.astype(jnp.float32)
    h_ref = jnp.maximum(x32 @ w1f + b1, 0.0)
    ref = h_ref.astype(jnp.bfloat16).astype(jnp.float32) @ w2f + b2

    assert out.shape == (batch, n_action)
    assert out.dtype == jnp.float32
    assert jnp.allclose(out, ref, atol=1e-4, rtol=1e-4)

    print("KERNEL_OK")
</pallas_src>

<mosaic_0001>
module attributes {stable_mosaic.version = 11 : i64} {
  func.func @mlp_kernel(%arg0: i32, %arg1: memref<512x4xbf16, #tpu.memory_space<vmem>>, %arg2: memref<4x128xbf16, #tpu.memory_space<vmem>>, %arg3: memref<1x128xf32, #tpu.memory_space<vmem>>, %arg4: memref<128x128xbf16, #tpu.memory_space<vmem>>, %arg5: memref<1x128xf32, #tpu.memory_space<vmem>>, %arg6: memref<512x128xf32, #tpu.memory_space<vmem>>) attributes {dimension_semantics = [#tpu.dimension_semantics<parallel>], iteration_bounds = array<i64: 4>, scalar_prefetch = 0 : i64, scratch_operands = 0 : i64, tpu.core_type = #tpu.core_type<tc>, window_params = [{transform_indices = @transform_0, window_bounds = array<i64: 512, 4>}, {pipeline_mode = #tpu.pipeline_mode<synchronous>, transform_indices = @transform_1, window_bounds = array<i64: 4, 128>}, {pipeline_mode = #tpu.pipeline_mode<synchronous>, transform_indices = @transform_2, window_bounds = array<i64: 1, 128>}, {pipeline_mode = #tpu.pipeline_mode<synchronous>, transform_indices = @transform_3, window_bounds = array<i64: 128, 128>}, {pipeline_mode = #tpu.pipeline_mode<synchronous>, transform_indices = @transform_4, window_bounds = array<i64: 1, 128>}, {transform_indices = @transform_5, window_bounds = array<i64: 512, 128>}]} {
    %c0 = arith.constant 0 : index
    %c0_0 = arith.constant 0 : index
    %0 = vector.load %arg1[%c0, %c0_0] : memref<512x4xbf16, #tpu.memory_space<vmem>>, vector<512x4xbf16>
    %c0_1 = arith.constant 0 : index
    %c0_2 = arith.constant 0 : index
    %1 = vector.load %arg2[%c0_1, %c0_2] : memref<4x128xbf16, #tpu.memory_space<vmem>>, vector<4x128xbf16>
    %cst = arith.constant dense<0.000000e+00> : vector<512x128xf32>
    %2 = tpu.matmul %0, %1, %cst {dimension_numbers = #tpu.dot_dimension_numbers<[1], [0], [0], [1], [0, 0, 1, 1], [], []>} : vector<512x4xbf16>, vector<4x128xbf16>, vector<512x128xf32> -> vector<512x128xf32>
    %c0_3 = arith.constant 0 : index
    %c0_4 = arith.constant 0 : index
    %3 = vector.load %arg3[%c0_3, %c0_4] : memref<1x128xf32, #tpu.memory_space<vmem>>, vector<1x128xf32>
    %4 = vector.broadcast %3 : vector<1x128xf32> to vector<512x128xf32>
    %5 = arith.addf %2, %4 : vector<512x128xf32>
    %cst_5 = arith.constant 0.000000e+00 : f32
    %6 = vector.broadcast %cst_5 : f32 to vector<512x128xf32>
    %7 = arith.maximumf %5, %6 : vector<512x128xf32>
    %8 = arith.truncf %7 : vector<512x128xf32> to vector<512x128xbf16>
    %c0_6 = arith.constant 0 : index
    %c0_7 = arith.constant 0 : index
    %9 = vector.load %arg4[%c0_6, %c0_7] : memref<128x128xbf16, #tpu.memory_space<vmem>>, vector<128x128xbf16>
    %cst_8 = arith.constant dense<0.000000e+00> : vector<512x128xf32>
    %10 = tpu.matmul %8, %9, %cst_8 {dimension_numbers = #tpu.dot_dimension_numbers<[1], [0], [0], [1], [0, 0, 1, 1], [], []>} : vector<512x128xbf16>, vector<128x128xbf16>, vector<512x128xf32> -> vector<512x128xf32>
    %c0_9 = arith.constant 0 : index
    %c0_10 = arith.constant 0 : index
    %11 = vector.load %arg5[%c0_9, %c0_10] : memref<1x128xf32, #tpu.memory_space<vmem>>, vector<1x128xf32>
    %12 = vector.broadcast %11 : vector<1x128xf32> to vector<512x128xf32>
    %13 = arith.addf %10, %12 : vector<512x128xf32>
    %c0_11 = arith.constant 0 : index
    %c0_12 = arith.constant 0 : index
    %14 = vector.load %arg6[%c0_11, %c0_12] : memref<512x128xf32, #tpu.memory_space<vmem>>, vector<512x128xf32>
    tpu.vector_store %arg6[%c0_11, %c0_12], %13 {strides = array<i32>} : memref<512x128xf32, #tpu.memory_space<vmem>>, vector<512x128xf32>,
    return
  }
  func.func @transform_0(%arg0: i32) -> (i32, i32) {
    %c0_i32 = arith.constant 0 : i32
    %c0_i32_0 = arith.constant 0 : i32
    return %arg0, %c0_i32 : i32, i32
  }
  func.func @transform_1(%arg0: i32) -> (i32, i32) {
    %c0_i32 = arith.constant 0 : i32
    %c0_i32_0 = arith.constant 0 : i32
    %c0_i32_1 = arith.constant 0 : i32
    return %c0_i32, %c0_i32_0 : i32, i32
  }
  func.func @transform_2(%arg0: i32) -> (i32, i32) {
    %c0_i32 = arith.constant 0 : i32
    %c0_i32_0 = arith.constant 0 : i32
    %c0_i32_1 = arith.constant 0 : i32
    return %c0_i32, %c0_i32_0 : i32, i32
  }
  func.func @transform_3(%arg0: i32) -> (i32, i32) {
    %c0_i32 = arith.constant 0 : i32
    %c0_i32_0 = arith.constant 0 : i32
    %c0_i32_1 = arith.constant 0 : i32
    return %c0_i32, %c0_i32_0 : i32, i32
  }
  func.func @transform_4(%arg0: i32) -> (i32, i32) {
    %c0_i32 = arith.constant 0 : i32
    %c0_i32_0 = arith.constant 0 : i32
    %c0_i32_1 = arith.constant 0 : i32
    return %c0_i32, %c0_i32_0 : i32, i32
  }
  func.func @transform_5(%arg0: i32) -> (i32, i32) {
    %c0_i32 = arith.constant 0 : i32
    %c0_i32_0 = arith.constant 0 : i32
    return %arg0, %c0_i32 : i32, i32
  }
}

</mosaic_0001>

<bundles_post_ra>
// kernel: net_forward.1
= control target key start
LH: loop header
LB: loop body
LE: loop exit
PB: predicated region body
PF: predicated region fallthrough
CT: control target
= control target key end

     0   :  { %s1481_s18 = smov 0   ;;  %s1799_s0 = inlined_call_operand.vmem [shape: bf16[2048,4], index: 0, kind: input, shape index: {}]   ;;  %s1800_s1 = inlined_call_operand.vmem [shape: bf16[4,128], index: 1, kind: input, shape index: {}]   ;;  %s1801_s2 = inlined_call_operand.vmem [shape: f32[1,128], index: 2, kind: input, shape index: {}]   ;;  %s1802_s3 = inlined_call_operand.vmem [shape: bf16[128,128], index: 3, kind: input, shape index: {}]   ;;  %s1803_s4 = inlined_call_operand.vmem [shape: f32[1,128], index: 4, kind: input, shape index: {}]   ;;  %s1804_s5 = inlined_call_operand.vmem [shape: f32[2048,128], index: 5, kind: output, shape index: {}]  }
   0x1 LB: > { %s1181_s19 = sadd.s32 4294967295, %s1449_s18   ;;  %p1185_p0 = scmp.ge.s32.totalorder %s1449_s18, 1  ;;  %s1449_s18 = sphi %s1481_s18, %s15_s18  }
   0x2   : > { %p188_p1 = scmp.lt.s32.totalorder %s1449_s18, 5 }
   0x4   : > { %p189_p2 = pnand %p1185_p0, %p188_p1 }
   0x5   : > { %s1186_s22 = sshll.u32 (!%p189_p2), %s1181_s19, 6 }
   0x6   : > { %192 = sbr.rel (%p189_p2) target bundleno = 795 (0x31b), region = 40  ;;  %p217_p3 = scmp.lt.s32.totalorder (!%p189_p2), %s1186_s22, 255 }
   0xb   : > { %v293_v0 = vld [vmem:[%s1800_s1] sm:$0x3]  ;;  %vm555_vm0 = vcmask 1041408   ;;  %s1806_s22 = smov (!%p217_p3, %s1186_s22), 255  ;;  %vm458_vm1 = vcmask 31744   ;;  %v1423_v7 = vld [vmem:[%s1802_s3 + $0x38] sm:$0xff] }
   0xc   : > { %v557_v1 = vsel %vm555_vm0, %v293_v0, 0  ;;  %s1187_s23 = sshll.u32 %s1806_s22, 2  ;;  %892 = vmatpush.bf16.msra.mxu1 %v1423_v7  ;;  %1425 = vmatpush.bf16.msra.mxu2 %v1423_v7  ;;  %v1422_v9 = vld [vmem:[%s1802_s3 + $0x30] sm:$0xff]  ;;  %v1421_v10 = vld [vmem:[%s1802_s3 + $0x28] sm:$0xff]  ;;  %v1420_v11 = vld [vmem:[%s1802_s3 + $0x20] sm:$0xff]  ;;  %s1189_s21 = sshll.u32 %s1806_s22, 3 }
   0xd   : > { %566 = vmatpush.bf16.msra.mxu0 %v557_v1  ;;  %1424 = vmatpush.bf16.msra.mxu3 %v557_v1  ;;  %s1498_s26 = scalar_lea.vmem %s1799_s0, %s1187_s23  ;;  %v1419_v12 = vld [vmem:[%s1802_s3 + $0x18] sm:$0xff]  ;;  %v1418_v14 = vld [vmem:[%s1802_s3 + $0x10] sm:$0xff]  ;;  %v1417_v15 = vld [vmem:[%s1802_s3 + $0x8] sm:$0xff]  ;;  %s1596_s28 = scalar_lea.vmem %s1804_s5, %s1189_s21 }
   0xe   : > { %v1384_v2 = vld [vmem:[%s1498_s26] sm:$0xff]  ;;  %v1385_v3 = vld [vmem:[%s1498_s26 + $0x8] sm:$0xff]  ;;  %v1386_v4 = vld [vmem:[%s1498_s26 + $0x10] sm:$0xff] }
   0xf   : > { %v1387_v5 = vld [vmem:[%s1498_s26 + $0x18] sm:$0xff]  ;;  %v1388_v6 = vld [vmem:[%s1498_s26 + $0x20] sm:$0xff]  ;;  %v1389_v8 = vld [vmem:[%s1498_s26 + $0x28] sm:$0xff] }
  0x10   : > { %1318 = vmatmul.msk.bf16.vlgmr.msra.gmra.mxu0 %vm458_vm1, %v1384_v2  ;;  %893 = vmatpush.bf16.msra.mxu1 %v1422_v9  ;;  %v1390_v13 = vld [vmem:[%s1498_s26 + $0x30] sm:$0xff]  ;;  %v1416_v16 = vld [vmem:[%s1802_s3] sm:$0xff]  ;;  %v1391_v17 = vld [vmem:[%s1498_s26 + $0x38] sm:$0xff] }
  0x11   : > { %1426 = vmatpush.bf16.msra.mxu2 %v1422_v9  ;;  %v1392_v18 = vld [vmem:[%s1498_s26 + $0x40] sm:$0xff]  ;;  %v1393_v27 = vld [vmem:[%s1498_s26 + $0x48] sm:$0xff]  ;;  %v1394_v35 = vld [vmem:[%s1498_s26 + $0x50] sm:$0xff] }
  0x12   : > { %v1544_v20 = vld [vmem:[%s1801_s2] ss:$0 sm:$0xff]  ;;  %v1395_v43 = vld [vmem:[%s1498_s26 + $0x58] sm:$0xff]  ;;  %v1397_v59 = vld [vmem:[%s1498_s26 + $0x68] sm:$0xff] }
  0x13   : > { %v1396_v51 = vld [vmem:[%s1498_s26 + $0x60] sm:$0xff] }
  0x14   : > { %894 = vmatpush.bf16.msra.mxu1 %v1421_v10 }
  0x15   : > { %1427 = vmatpush.bf16.msra.mxu2 %v1421_v10 }
  0x18   : > { %895 = vmatpush.bf16.msra.mxu1 %v1420_v11 }
  0x19   : > { %1428 = vmatpush.bf16.msra.mxu2 %v1420_v11 }
  0x1c   : > { %896 = vmatpush.bf16.msra.mxu1 %v1419_v12 }
  0x1d   : > { %1429 = vmatpush.bf16.msra.mxu2 %v1419_v12  ;;  %v1399_v12 = vld [vmem:[%s1498_s26 + $0x78] sm:$0xff] }
  0x20   : > { %1319 = vmatmul.msk.bf16.gmra.mxu0 %vm458_vm1, %v1385_v3  ;;  %897 = vmatpush.bf16.msra.mxu1 %v1418_v14  ;;  %v1398_v3 = vld [vmem:[%s1498_s26 + $0x70] sm:$0xff] }
  0x21   : > { %1430 = vmatpush.bf16.msra.mxu2 %v1418_v14  ;;  %v1402_v14 = vld [vmem:[%s1498_s26 + $0x90] sm:$0xff] }
  0x24   : > { %898 = vmatpush.bf16.msra.mxu1 %v1417_v15 }
  0x25   : > { %1431 = vmatpush.bf16.msra.mxu2 %v1417_v15 }
  0x28   : > { %899 = vmatpush.bf16.msra.mxu1 %v1416_v16 }
  0x29   : > { %1432 = vmatpush.bf16.msra.mxu2 %v1416_v16 }
  0x30   : > { %1320 = vmatmul.msk.bf16.gmra.mxu0 %vm458_vm1, %v1386_v4 }
  0x40   : > { %1321 = vmatmul.msk.bf16.gmra.mxu0 %vm458_vm1, %v1387_v5  ;;  %v1401_v5 = vld [vmem:[%s1498_s26 + $0x88] sm:$0xff] }
  0x41   : > { %1335 = vmatmul.msk.bf16.vlgmr.msra.gmra.mxu3 %vm458_vm1, %v1401_v5 }
  0x50   : > { %1322 = vmatmul.msk.bf16.gmra.mxu0 %vm458_vm1, %v1388_v6 }
  0x51   : > { %1336 = vmatmul.msk.bf16.gmra.mxu3 %vm458_vm1, %v1402_v14 }
  0x60   : > { %1323 = vmatmul.msk.bf16.gmra.mxu0 %vm458_vm1, %v1389_v8 }
  0x70   : > { %1324 = vmatmul.msk.bf16.gmra.mxu0 %vm458_vm1, %v1390_v13 }
  0x80   : > { %1325 = vmatmul.msk.bf16.gmra.mxu0 %vm458_vm1, %v1391_v17 }
  0x8d   : > { %v568_v19 = vpop.f32.mrf.mxu0 }
  0x8e   : > { %v569_v21 = vadd.f32 %v1544_v20, %v568_v19 }
  0x90   : > { %1326 = vmatmul.msk.bf16.gmra.mxu0 %vm458_vm1, %v1392_v18  ;;  %v728_v24 = vmax.f32 %v569_v21, 0.0 }
  0x95   : > { %v570_v22 = vpop.f32.mrf.mxu0 }
  0x96   : > { %v571_v23 = vadd.f32 %v1544_v20, %v570_v22  ;;  %v1400_v22 = vld [vmem:[%s1498_s26 + $0x80] sm:$0xff] }
  0x98   : > { %v729_v25 = vmax.f32 %v571_v23, 0.0 }
  0x9a   : > { %v792_v26 = vpack.c.bf16 %v729_v25, %v728_v24  ;;  %v1403_v24 = vld [vmem:[%s1498_s26 + $0x98] sm:$0xff] }
  0x9b   : > { %1337 = vmatmul.msk.bf16.gmra.mxu3 %vm458_vm1, %v1403_v24 }
  0x9c   : > { %900 = vmatmul.bf16.vlgmr.msra.gmra.mxu1 %v792_v26 }
  0x9d   : > { %v573_v28 = vpop.f32.mrf.mxu0 }
  0x9e   : > { %v574_v29 = vadd.f32 %v1544_v20, %v573_v28  ;;  %v1591_v28 = vld [vmem:[%s1803_s4] ss:$0 sm:$0xff] }
  0xa0   : > { %1327 = vmatmul.msk.bf16.gmra.mxu0 %vm458_vm1, %v1393_v27  ;;  %v730_v32 = vmax.f32 %v574_v29, 0.0 }
  0xa5   : > { %v575_v30 = vpop.f32.mrf.mxu0 }
  0xa6   : > { %v576_v31 = vadd.f32 %v1544_v20, %v575_v30 }
  0xa8   : > { %v731_v33 = vmax.f32 %v576_v31, 0.0 }
  0xaa   : > { %v793_v34 = vpack.c.bf16 %v731_v33, %v730_v32 }
  0xac   : > { %905 = vmatmul.bf16.gmra.mxu1 %v793_v34 }
  0xad   : > { %v578_v36 = vpop.f32.mrf.mxu0 }
  0xae   : > { %v579_v37 = vadd.f32 %v1544_v20, %v578_v36 }
  0xb0   : > { %1328 = vmatmul.msk.bf16.gmra.mxu0 %vm458_vm1, %v1394_v35  ;;  %v732_v40 = vmax.f32 %v579_v37, 0.0  ;;  %v1404_v35 = vld [vmem:[%s1498_s26 + $0xa0] sm:$0xff] }
  0xb1   : > { %1338 = vmatmul.msk.bf16.gmra.mxu3 %vm458_vm1, %v1404_v35 }
  0xb5   : > { %v580_v38 = vpop.f32.mrf.mxu0 }
  0xb6   : > { %v581_v39 = vadd.f32 %v1544_v20, %v580_v38 }
  0xb8   : > { %v733_v41 = vmax.f32 %v581_v39, 0.0 }
  0xba   : > { %v794_v42 = vpack.c.bf16 %v733_v41, %v732_v40 }
  0xbc   : > { %910 = vmatmul.bf16.gmra.mxu1 %v794_v42 }
  0xbd   : > { %v583_v44 = vpop.f32.mrf.mxu0 }
  0xbe   : > { %v584_v45 = vadd.f32 %v1544_v20, %v583_v44 }
  0xc0   : > { %1329 = vmatmul.msk.bf16.gmra.mxu0 %vm458_vm1, %v1395_v43  ;;  %v734_v48 = vmax.f32 %v584_v45, 0.0 }
  0xc5   : > { %v585_v46 = vpop.f32.mrf.mxu0 }
  0xc6   : > { %v586_v47 = vadd.f32 %v1544_v20, %v585_v46 }
  0xc8   : > { %v735_v49 = vmax.f32 %v586_v47, 0.0  ;;  %v1405_v47 = vld [vmem:[%s1498_s26 + $0xa8] sm:$0xff] }
  0xc9   : > { %1339 = vmatmul.msk.bf16.gmra.mxu3 %vm458_vm1, %v1405_v47  ;;  %v1410_v47 = vld [vmem:[%s1498_s26 + $0xd0] sm:$0xff] }
  0xca   : > { %v795_v50 = vpack.c.bf16 %v735_v49, %v734_v48 }
  0xcc   : > { %915 = vmatmul.bf16.gmra.mxu1 %v795_v50 }
  0xcd   : > { %v588_v52 = vpop.f32.mrf.mxu0 }
  0xce   : > { %v589_v53 = vadd.f32 %v1544_v20, %v588_v52 }
  0xd0   : > { %1330 = vmatmul.msk.bf16.gmra.mxu0 %vm458_vm1, %v1396_v51  ;;  %v736_v56 = vmax.f32 %v589_v53, 0.0 }
  0xd5   : > { %v590_v54 = vpop.f32.mrf.mxu0 }
  0xd6   : > { %v591_v55 = vadd.f32 %v1544_v20, %v590_v54 }
  0xd8   : > { %v737_v57 = vmax.f32 %v591_v55, 0.0 }
  0xda   : > { %v796_v58 = vpack.c.bf16 %v737_v57, %v736_v56 }
  0xdc   : > { %920 = vmatmul.bf16.gmra.mxu1 %v796_v58 }
  0xdd   : > { %v593_v60 = vpop.f32.mrf.mxu0 }
  0xde   : > { %v594_v61 = vadd.f32 %v1544_v20, %v593_v60 }
  0xe0   : > { %1331 = vmatmul.msk.bf16.gmra.mxu0 %vm458_vm1, %v1397_v59  ;;  %v738_v0 = vmax.f32 %v594_v61, 0.0  ;;  %v1406_v59 = vld [vmem:[%s1498_s26 + $0xb0] sm:$0xff] }
  0xe1   : > { %1340 = vmatmul.msk.bf16.gmra.mxu3 %vm458_vm1, %v1406_v59 }
  0xe5   : > { %v595_v62 = vpop.f32.mrf.mxu0 }
  0xe6   : > { %v596_v63 = vadd.f32 %v1544_v20, %v595_v62 }
  0xe8   : > { %v739_v1 = vmax.f32 %v596_v63, 0.0 }
  0xea   : > { %v797_v2 = vpack.c.bf16 %v739_v1, %v738_v0 }
  0xec   : > { %925 = vmatmul.bf16.gmra.mxu1 %v797_v2 }
  0xed   : > { %v598_v4 = vpop.f32.mrf.mxu0 }
  0xee   : > { %v599_v6 = vadd.f32 %v1544_v20, %v598_v4 }
  0xf0   : > { %1332 = vmatmul.msk.bf16.gmra.mxu0 %vm458_vm1, %v1398_v3  ;;  %v740_v9 = vmax.f32 %v599_v6, 0.0 }
  0xf5   : > { %v600_v7 = vpop.f32.mrf.mxu0 }
  0xf6   : > { %v601_v8 = vadd.f32 %v1544_v20, %v600_v7  ;;  %v1407_v7 = vld [vmem:[%s1498_s26 + $0xb8] sm:$0xff] }
  0xf7   : > { %1341 = vmatmul.msk.bf16.gmra.mxu3 %vm458_vm1, %v1407_v7 }
  0xf8   : > { %v741_v10 = vmax.f32 %v601_v8, 0.0 }
  0xfa   : > { %v798_v11 = vpack.c.bf16 %v741_v10, %v740_v9 }
  0xfc   : > { %930 = vmatmul.bf16.gmra.mxu1 %v798_v11 }
  0xfd   : > { %v603_v13 = vpop.f32.mrf.mxu0 }
  0xfe   : > { %v604_v15 = vadd.f32 %v1544_v20, %v603_v13 }
 0x100   : > { %1333 = vmatmul.msk.bf16.gmra.mxu0 %vm458_vm1, %v1399_v12  ;;  %v742_v18 = vmax.f32 %v604_v15, 0.0 }
 0x105   : > { %v605_v16 = vpop.f32.mrf.mxu0 }
 0x106   : > { %v606_v17 = vadd.f32 %v1544_v20, %v605_v16 }
 0x108   : > { %v743_v19 = vmax.f32 %v606_v17, 0.0 }
 0x10a   : > { %v799_v21 = vpack.c.bf16 %v743_v19, %v742_v18  ;;  %v1408_v19 = vld [vmem:[%s1498_s26 + $0xc0] sm:$0xff] }
 0x10b   : > { %1342 = vmatmul.msk.bf16.gmra.mxu3 %vm458_vm1, %v1408_v19 }
 0x10c   : > { %935 = vmatmul.bf16.gmra.mxu1 %v799_v21 }
 0x10d   : > { %v608_v23 = vpop.f32.mrf.mxu0 }
 0x10e   : > { %v609_v25 = vadd.f32 %v1544_v20, %v608_v23 }
 0x110   : > { %1334 = vmatmul.msk.bf16.gmra.mxu0 %vm458_vm1, %v1400_v22  ;;  %v744_v29 = vmax.f32 %v609_v25, 0.0 }
 0x115   : > { %v610_v26 = vpop.f32.mrf.mxu0 }
 0x116   : > { %v611_v27 = vadd.f32 %v1544_v20, %v610_v26 }
 0x118   : > { %v745_v30 = vmax.f32 %v611_v27, 0.0 }
 0x119   : > { %v901_v31 = vpop.f32.mrf.mxu1 }
 0x11a   : > { %v902_v32 = vadd.f32 %v1591_v28, %v901_v31  ;;  %v800_v33 = vpack.c.bf16 %v745_v30, %v744_v29 }
 0x11c   : > { %1061 = vst [vmem:[%s1596_s28] sm:$0xff] %v902_v32  ;;  %940 = vmatmul.bf16.gmra.mxu1 %v800_v33  ;;  %v1409_v33 = vld [vmem:[%s1498_s26 + $0xc8] sm:$0xff] }
 0x11d   : > { %v613_v34 = vpop.f32.mrf.mxu0  ;;  %1343 = vmatmul.msk.bf16.gmra.mxu3 %vm458_vm1, %v1409_v33 }
 0x11e   : > { %v614_v38 = vadd.f32 %v1544_v20, %v613_v34 }
 0x120   : > { %v746_v41 = vmax.f32 %v614_v38, 0.0  ;;  %v653_v38 = vpop.f32.mrf.mxu3 }
 0x121   : > { %v903_v36 = vpop.f32.mrf.mxu1 }
 0x122   : > { %v904_v37 = vadd.f32 %v1591_v28, %v903_v36 }
 0x124   : > { %1062 = vst [vmem:[%s1596_s28 + $0x8] sm:$0xff] %v904_v37 }
 0x125   : > { %v615_v39 = vpop.f32.mrf.mxu0 }
 0x126   : > { %v616_v40 = vadd.f32 %v1544_v20, %v615_v39 }
 0x128   : > { %v747_v42 = vmax.f32 %v616_v40, 0.0 }
 0x129   : > { %v906_v43 = vpop.f32.mrf.mxu1 }
 0x12a   : > { %v907_v44 = vadd.f32 %v1591_v28, %v906_v43  ;;  %v801_v45 = vpack.c.bf16 %v747_v42, %v746_v41 }
 0x12c   : > { %1063 = vst [vmem:[%s1596_s28 + $0x10] sm:$0xff] %v907_v44  ;;  %945 = vmatmul.bf16.gmra.mxu1 %v801_v45 }
 0x12d   : > { %v618_v46 = vpop.f32.mrf.mxu0  ;;  %1344 = vmatmul.msk.bf16.gmra.mxu3 %vm458_vm1, %v1410_v47 }
 0x12e   : > { %v619_v50 = vadd.f32 %v1544_v20, %v618_v46  ;;  %v655_v46 = vpop.f32.mrf.mxu3 }
 0x130   : > { %v748_v53 = vmax.f32 %v619_v50, 0.0 }
 0x131   : > { %v908_v48 = vpop.f32.mrf.mxu1 }
 0x132   : > { %v909_v49 = vadd.f32 %v1591_v28, %v908_v48 }
 0x134   : > { %1064 = vst [vmem:[%s1596_s28 + $0x18] sm:$0xff] %v909_v49 }
 0x135   : > { %v620_v51 = vpop.f32.mrf.mxu0 }
 0x136   : > { %v621_v52 = vadd.f32 %v1544_v20, %v620_v51 }
 0x138   : > { %v749_v54 = vmax.f32 %v621_v52, 0.0  ;;  %v658_v52 = vpop.f32.mrf.mxu3 }
 0x139   : > { %v911_v55 = vpop.f32.mrf.mxu1 }
 0x13a   : > { %v912_v56 = vadd.f32 %v1591_v28, %v911_v55  ;;  %v802_v57 = vpack.c.bf16 %v749_v54, %v748_v53 }
 0x13c   : > { %1065 = vst [vmem:[%s1596_s28 + $0x20] sm:$0xff] %v912_v56  ;;  %950 = vmatmul.bf16.gmra.mxu1 %v802_v57 }
 0x13d   : > { %v623_v58 = vpop.f32.mrf.mxu0 }
 0x13e   : > { %v624_v62 = vadd.f32 %v1544_v20, %v623_v58 }
 0x140   : > { %v750_v1 = vmax.f32 %v624_v62, 0.0 }
 0x141   : > { %v913_v60 = vpop.f32.mrf.mxu1 }
 0x142   : > { %v914_v61 = vadd.f32 %v1591_v28, %v913_v60  ;;  %v660_v60 = vpop.f32.mrf.mxu3 }
 0x144   : > { %1066 = vst [vmem:[%s1596_s28 + $0x28] sm:$0xff] %v914_v61  ;;  %v1411_v61 = vld [vmem:[%s1498_s26 + $0xd8] sm:$0xff] }
 0x145   : > { %v625_v63 = vpop.f32.mrf.mxu0  ;;  %1345 = vmatmul.msk.bf16.gmra.mxu3 %vm458_vm1, %v1411_v61 }
 0x146   : > { %v626_v0 = vadd.f32 %v1544_v20, %v625_v63 }
 0x148   : > { %v751_v2 = vmax.f32 %v626_v0, 0.0 }
 0x149   : > { %v916_v3 = vpop.f32.mrf.mxu1 }
 0x14a   : > { %v917_v4 = vadd.f32 %v1591_v28, %v916_v3  ;;  %v803_v5 = vpack.c.bf16 %v751_v2, %v750_v1  ;;  %v663_v2 = vpop.f32.mrf.mxu3 }
 0x14c   : > { %1067 = vst [vmem:[%s1596_s28 + $0x30] sm:$0xff] %v917_v4  ;;  %955 = vmatmul.bf16.gmra.mxu1 %v803_v5 }
 0x14d   : > { %v628_v6 = vpop.f32.mrf.mxu0 }
 0x14e   : > { %v629_v10 = vadd.f32 %v1544_v20, %v628_v6 }
 0x150   : > { %v752_v13 = vmax.f32 %v629_v10, 0.0  ;;  %v1412_v10 = vld [vmem:[%s1498_s26 + $0xe0] sm:$0xff] }
 0x151   : > { %v918_v8 = vpop.f32.mrf.mxu1 }
 0x152   : > { %v919_v9 = vadd.f32 %v1591_v28, %v918_v8 }
 0x154   : > { %1068 = vst [vmem:[%s1596_s28 + $0x38] sm:$0xff] %v919_v9  ;;  %v665_v9 = vpop.f32.mrf.mxu3 }
 0x155   : > { %v630_v11 = vpop.f32.mrf.mxu0  ;;  %1346 = vmatmul.msk.bf16.gmra.mxu3 %vm458_vm1, %v1412_v10 }
 0x156   : > { %v631_v12 = vadd.f32 %v1544_v20, %v630_v11 }
 0x158   : > { %v753_v14 = vmax.f32 %v631_v12, 0.0  ;;  %v654_v12 = vadd.f32 %v1544_v20, %v653_v38  ;;  %v664_v38 = vadd.f32 %v1544_v20, %v663_v2 }
 0x159   : > { %v921_v15 = vpop.f32.mrf.mxu1 }
 0x15a   : > { %v804_v16 = vpack.c.bf16 %v753_v14, %v752_v13  ;;  %v922_v17 = vadd.f32 %v1591_v28, %v921_v15  ;;  %v656_v13 = vadd.f32 %v1544_v20, %v655_v46 }
 0x15c   : > { %1069 = vst [vmem:[%s1596_s28 + $0x40] sm:$0xff] %v922_v17  ;;  %960 = vmatmul.bf16.gmra.mxu1 %v804_v16  ;;  %v668_v15 = vpop.f32.mrf.mxu3  ;;  %v762_v16 = vmax.f32 %v654_v12, 0.0  ;;  %v763_v17 = vmax.f32 %v656_v13, 0.0 }
 0x15d   : > { %v633_v18 = vpop.f32.mrf.mxu0 }
 0x15e   : > { %v634_v23 = vadd.f32 %v1544_v20, %v633_v18 }
 0x160   : > { %v754_v26 = vmax.f32 %v634_v23, 0.0  ;;  %v1413_v23 = vld [vmem:[%s1498_s26 + $0xe8] sm:$0xff] }
 0x161   : > { %v923_v21 = vpop.f32.mrf.mxu1 }
 0x162   : > { %v924_v22 = vadd.f32 %v1591_v28, %v923_v21  ;;  %v809_v21 = vpack.c.bf16 %v763_v17, %v762_v16 }
 0x164   : > { %1070 = vst [vmem:[%s1596_s28 + $0x48] sm:$0xff] %v924_v22  ;;  %v670_v22 = vpop.f32.mrf.mxu3 }
 0x165   : > { %v635_v24 = vpop.f32.mrf.mxu0  ;;  %1347 = vmatmul.msk.bf16.gmra.mxu3 %vm458_vm1, %v1413_v23 }
 0x166   : > { %v636_v25 = vadd.f32 %v1544_v20, %v635_v24 }
 0x168   : > { %v755_v27 = vmax.f32 %v636_v25, 0.0  ;;  %v659_v25 = vadd.f32 %v1544_v20, %v658_v52 }
 0x169   : > { %v926_v29 = vpop.f32.mrf.mxu1 }
 0x16a   : > { %v805_v30 = vpack.c.bf16 %v755_v27, %v754_v26  ;;  %v927_v31 = vadd.f32 %v1591_v28, %v926_v29  ;;  %v661_v26 = vadd.f32 %v1544_v20, %v660_v60 }
 0x16c   : > { %1071 = vst [vmem:[%s1596_s28 + $0x50] sm:$0xff] %v927_v31  ;;  %965 = vmatmul.bf16.gmra.mxu1 %v805_v30  ;;  %v673_v29 = vpop.f32.mrf.mxu3  ;;  %v764_v30 = vmax.f32 %v659_v25, 0.0  ;;  %v765_v31 = vmax.f32 %v661_v26, 0.0 }
 0x16d   : > { %v638_v32 = vpop.f32.mrf.mxu0  ;;  %v674_v61 = vadd.f32 %v1544_v20, %v673_v29 }
 0x16e   : > { %v639_v36 = vadd.f32 %v1544_v20, %v638_v32 }
 0x170   : > { %v756_v40 = vmax.f32 %v639_v36, 0.0  ;;  %v1414_v36 = vld [vmem:[%s1498_s26 + $0xf0] sm:$0xff] }
 0x171   : > { %v928_v34 = vpop.f32.mrf.mxu1 }
 0x172   : > { %v929_v35 = vadd.f32 %v1591_v28, %v928_v34  ;;  %v810_v34 = vpack.c.bf16 %v765_v31, %v764_v30 }
 0x174   : > { %1072 = vst [vmem:[%s1596_s28 + $0x58] sm:$0xff] %v929_v35  ;;  %v675_v35 = vpop.f32.mrf.mxu3 }
 0x175   : > { %v640_v37 = vpop.f32.mrf.mxu0  ;;  %1348 = vmatmul.msk.bf16.gmra.mxu3 %vm458_vm1, %v1414_v36 }
 0x176   : > { %v641_v39 = vadd.f32 %v1544_v20, %v640_v37 }
 0x178   : > { %v757_v41 = vmax.f32 %v641_v39, 0.0  ;;  %v666_v39 = vadd.f32 %v1544_v20, %v665_v9 }
 0x179   : > { %v931_v42 = vpop.f32.mrf.mxu1 }
 0x17a   : > { %v806_v43 = vpack.c.bf16 %v757_v41, %v756_v40  ;;  %v932_v44 = vadd.f32 %v1591_v28, %v931_v42  ;;  %v766_v42 = vmax.f32 %v664_v38, 0.0 }
 0x17c   : > { %1073 = vst [vmem:[%s1596_s28 + $0x60] sm:$0xff] %v932_v44  ;;  %970 = vmatmul.bf16.gmra.mxu1 %v806_v43  ;;  %v678_v41 = vpop.f32.mrf.mxu3  ;;  %v767_v43 = vmax.f32 %v666_v39, 0.0 }
 0x17d   : > { %v643_v45 = vpop.f32.mrf.mxu0 }
 0x17e   : > { %v644_v50 = vadd.f32 %v1544_v20, %v643_v45  ;;  %v811_v46 = vpack.c.bf16 %v767_v43, %v766_v42 }
 0x180   : > { %v758_v54 = vmax.f32 %v644_v50, 0.0  ;;  %v669_v50 = vadd.f32 %v1544_v20, %v668_v15 }
 0x181   : > { %v933_v48 = vpop.f32.mrf.mxu1 }
 0x182   : > { %v934_v49 = vadd.f32 %v1591_v28, %v933_v48  ;;  %v1415_v48 = vld [vmem:[%s1498_s26 + $0xf8] sm:$0xff] }
 0x184   : > { %1074 = vst [vmem:[%s1596_s28 + $0x68] sm:$0xff] %v934_v49  ;;  %v680_v47 = vpop.f32.mrf.mxu3 }
 0x185   : > { %v645_v51 = vpop.f32.mrf.mxu0  ;;  %1349 = vmatmul.msk.bf16.gmra.mxu3 %vm458_vm1, %v1415_v48 }
 0x186   : > { %v646_v53 = vadd.f32 %v1544_v20, %v645_v51  ;;  %v671_v51 = vadd.f32 %v1544_v20, %v670_v22 }
 0x188   : > { %v759_v55 = vmax.f32 %v646_v53, 0.0 }
 0x189   : > { %v936_v56 = vpop.f32.mrf.mxu1 }
 0x18a   : > { %v807_v57 = vpack.c.bf16 %v759_v55, %v758_v54  ;;  %v937_v58 = vadd.f32 %v1591_v28, %v936_v56  ;;  %v768_v54 = vmax.f32 %v669_v50, 0.0  ;;  %v769_v55 = vmax.f32 %v671_v51, 0.0 }
 0x18c   : > { %1075 = vst [vmem:[%s1596_s28 + $0x70] sm:$0xff] %v937_v58  ;;  %975 = vmatmul.bf16.gmra.mxu1 %v807_v57  ;;  %v683_v53 = vpop.f32.mrf.mxu3  ;;  %v812_v58 = vpack.c.bf16 %v769_v55, %v768_v54 }
 0x18d   : > { %v648_v59 = vpop.f32.mrf.mxu0 }
 0x18e   : > { %v649_v0 = vadd.f32 %v1544_v20, %v648_v59 }
 0x190   : > { %v760_v4 = vmax.f32 %v649_v0, 0.0  ;;  %v770_v0 = vmax.f32 %v674_v61, 0.0 }
 0x191   : > { %v938_v62 = vpop.f32.mrf.mxu1 }
 0x192   : > { %v939_v63 = vadd.f32 %v1591_v28, %v938_v62  ;;  %v676_v62 = vadd.f32 %v1544_v20, %v675_v35 }
 0x194   : > { %1076 = vst [vmem:[%s1596_s28 + $0x78] sm:$0xff] %v939_v63  ;;  %v685_v59 = vpop.f32.mrf.mxu3 }
 0x195   : > { %v650_v1 = vpop.f32.mrf.mxu0 }
 0x196   : > { %v651_v3 = vadd.f32 %v1544_v20, %v650_v1  ;;  %v771_v1 = vmax.f32 %v676_v62, 0.0 }
 0x198   : > { %v761_v5 = vmax.f32 %v651_v3, 0.0 }
 0x199   : > { %v941_v6 = vpop.f32.mrf.mxu1 }
 0x19a   : > { %v942_v7 = vadd.f32 %v1591_v28, %v941_v6  ;;  %v808_v8 = vpack.c.bf16 %v761_v5, %v760_v4  ;;  %v813_v5 = vpack.c.bf16 %v771_v1, %v770_v0 }
 0x19c   : > { %1077 = vst [vmem:[%s1596_s28 + $0x80] sm:$0xff] %v942_v7  ;;  %980 = vmatmul.bf16.vlgmr.msra.gmra.mxu2 %v808_v8  ;;  %v688_v3 = vpop.f32.mrf.mxu3  ;;  %v679_v7 = vadd.f32 %v1544_v20, %v678_v41  ;;  %v681_v8 = vadd.f32 %v1544_v20, %v680_v47 }
 0x19d   : > { %v689_v31 = vadd.f32 %v1544_v20, %v688_v3 }
 0x19e   : > { %v773_v12 = vmax.f32 %v681_v8, 0.0 }
 0x1a1   : > { %v943_v11 = vpop.f32.mrf.mxu1 }
 0x1a2   : > { %v944_v14 = vadd.f32 %v1591_v28, %v943_v11  ;;  %v772_v11 = vmax.f32 %v679_v7, 0.0 }
 0x1a4   : > { %1078 = vst [vmem:[%s1596_s28 + $0x88] sm:$0xff] %v944_v14  ;;  %v690_v10 = vpop.f32.mrf.mxu3  ;;  %v814_v15 = vpack.c.bf16 %v773_v12, %v772_v11 }
 0x1a9   : > { %v946_v18 = vpop.f32.mrf.mxu1 }
 0x1aa   : > { %v947_v19 = vadd.f32 %v1591_v28, %v946_v18  ;;  %v684_v18 = vadd.f32 %v1544_v20, %v683_v53 }
 0x1ac   : > { %1079 = vst [vmem:[%s1596_s28 + $0x90] sm:$0xff] %v947_v19  ;;  %985 = vmatmul.bf16.gmra.mxu2 %v809_v21  ;;  %v693_v16 = vpop.f32.mrf.mxu3  ;;  %v686_v19 = vadd.f32 %v1544_v20, %v685_v59  ;;  %v774_v22 = vmax.f32 %v684_v18, 0.0 }
 0x1ae   : > { %v775_v23 = vmax.f32 %v686_v19, 0.0 }
 0x1b1   : > { %v948_v24 = vpop.f32.mrf.mxu1 }
 0x1b2   : > { %v949_v27 = vadd.f32 %v1591_v28, %v948_v24 }
 0x1b4   : > { %1080 = vst [vmem:[%s1596_s28 + $0x98] sm:$0xff] %v949_v27  ;;  %v695_v24 = vpop.f32.mrf.mxu3  ;;  %v815_v27 = vpack.c.bf16 %v775_v23, %v774_v22 }
 0x1b5   : > { %v696_v41 = vadd.f32 %v1544_v20, %v695_v24 }
 0x1b9   : > { %v951_v32 = vpop.f32.mrf.mxu1 }
 0x1ba   : > { %v952_v33 = vadd.f32 %v1591_v28, %v951_v32  ;;  %v691_v32 = vadd.f32 %v1544_v20, %v690_v10 }
 0x1bc   : > { %1081 = vst [vmem:[%s1596_s28 + $0xa0] sm:$0xff] %v952_v33  ;;  %990 = vmatmul.bf16.gmra.mxu2 %v810_v34  ;;  %v698_v30 = vpop.f32.mrf.mxu3  ;;  %v776_v34 = vmax.f32 %v689_v31, 0.0  ;;  %v777_v35 = vmax.f32 %v691_v32, 0.0 }
 0x1bd   : > { %v699_v51 = vadd.f32 %v1544_v20, %v698_v30 }
 0x1be   : > { %v816_v36 = vpack.c.bf16 %v777_v35, %v776_v34 }
 0x1bf   : > { %v780_v53 = vmax.f32 %v699_v51, 0.0 }
 0x1c1   : > { %v953_v37 = vpop.f32.mrf.mxu1 }
 0x1c2   : > { %v954_v40 = vadd.f32 %v1591_v28, %v953_v37 }
 0x1c4   : > { %1082 = vst [vmem:[%s1596_s28 + $0xa8] sm:$0xff] %v954_v40  ;;  %v700_v37 = vpop.f32.mrf.mxu3  ;;  %v694_v40 = vadd.f32 %v1544_v20, %v693_v16 }
 0x1c6   : > { %v778_v43 = vmax.f32 %v694_v40, 0.0 }
 0x1c9   : > { %v956_v44 = vpop.f32.mrf.mxu1 }
 0x1ca   : > { %v957_v45 = vadd.f32 %v1591_v28, %v956_v44  ;;  %v779_v44 = vmax.f32 %v696_v41, 0.0 }
 0x1cc   : > { %1083 = vst [vmem:[%s1596_s28 + $0xb0] sm:$0xff] %v957_v45  ;;  %995 = vmatmul.bf16.gmra.mxu2 %v811_v46  ;;  %v703_v42 = vpop.f32.mrf.mxu3  ;;  %v817_v47 = vpack.c.bf16 %v779_v44, %v778_v43 }
 0x1cd   : > { %v704_v61 = vadd.f32 %v1544_v20, %v703_v42 }
 0x1cf   : > { %v782_v0 = vmax.f32 %v704_v61, 0.0 }
 0x1d1   : > { %v958_v49 = vpop.f32.mrf.mxu1 }
 0x1d2   : > { %v959_v52 = vadd.f32 %v1591_v28, %v958_v49 }
 0x1d4   : > { %1084 = vst [vmem:[%s1596_s28 + $0xb8] sm:$0xff] %v959_v52  ;;  %v705_v49 = vpop.f32.mrf.mxu3  ;;  %v701_v52 = vadd.f32 %v1544_v20, %v700_v37 }
 0x1d5   : > { %v706_v62 = vadd.f32 %v1544_v20, %v705_v49 }
 0x1d6   : > { %v781_v54 = vmax.f32 %v701_v52, 0.0 }
 0x1d7   : > { %v783_v1 = vmax.f32 %v706_v62, 0.0 }
 0x1d9   : > { %v961_v56 = vpop.f32.mrf.mxu1 }
 0x1da   : > { %v962_v57 = vadd.f32 %v1591_v28, %v961_v56 }
 0x1dc   : > { %1085 = vst [vmem:[%s1596_s28 + $0xc0] sm:$0xff] %v962_v57  ;;  %1000 = vmatmul.bf16.gmra.mxu2 %v812_v58  ;;  %v708_v57 = vpop.f32.mrf.mxu3  ;;  %v818_v58 = vpack.c.bf16 %v781_v54, %v780_v53 }
 0x1dd   : > { %v709_v8 = vadd.f32 %v1544_v20, %v708_v57 }
 0x1df   : > { %v784_v10 = vmax.f32 %v709_v8, 0.0 }
 0x1e1   : > { %v963_v60 = vpop.f32.mrf.mxu1 }
 0x1e2   : > { %v964_v63 = vadd.f32 %v1591_v28, %v963_v60 }
 0x1e4   : > { %1086 = vst [vmem:[%s1596_s28 + $0xc8] sm:$0xff] %v964_v63  ;;  %v710_v63 = vpop.f32.mrf.mxu3 }
 0x1e9   : > { %v966_v2 = vpop.f32.mrf.mxu1 }
 0x1ea   : > { %v967_v4 = vadd.f32 %v1591_v28, %v966_v2 }
 0x1ec   : > { %1087 = vst [vmem:[%s1596_s28 + $0xd0] sm:$0xff] %v967_v4  ;;  %1005 = vmatmul.bf16.gmra.mxu2 %v813_v5  ;;  %v819_v4 = vpack.c.bf16 %v783_v1, %v782_v0  ;;  %v713_v5 = vpop.f32.mrf.mxu3 }
 0x1ed   : > { %v714_v19 = vadd.f32 %v1544_v20, %v713_v5 }
 0x1ef   : > { %v786_v22 = vmax.f32 %v714_v19, 0.0 }
 0x1f1   : > { %v968_v6 = vpop.f32.mrf.mxu1 }
 0x1f2   : > { %v969_v9 = vadd.f32 %v1591_v28, %v968_v6 }
 0x1f4   : > { %1088 = vst [vmem:[%s1596_s28 + $0xd8] sm:$0xff] %v969_v9  ;;  %v711_v9 = vadd.f32 %v1544_v20, %v710_v63 }
 0x1f6   : > { %v785_v11 = vmax.f32 %v711_v9, 0.0 }
 0x1f9   : > { %v971_v13 = vpop.f32.mrf.mxu1 }
 0x1fa   : > { %v972_v14 = vadd.f32 %v1591_v28, %v971_v13  ;;  %v715_v13 = vpop.f32.mrf.mxu3 }
 0x1fc   : > { %1089 = vst [vmem:[%s1596_s28 + $0xe0] sm:$0xff] %v972_v14  ;;  %1010 = vmatmul.bf16.gmra.mxu2 %v814_v15  ;;  %v820_v15 = vpack.c.bf16 %v785_v11, %v784_v10 }
 0x201   : > { %v973_v17 = vpop.f32.mrf.mxu1 }
 0x202   : > { %v974_v21 = vadd.f32 %v1591_v28, %v973_v17  ;;  %v718_v18 = vpop.f32.mrf.mxu3 }
 0x203   : > { %v719_v31 = vadd.f32 %v1544_v20, %v718_v18 }
 0x204   : > { %1090 = vst [vmem:[%s1596_s28 + $0xe8] sm:$0xff] %v974_v21  ;;  %v716_v21 = vadd.f32 %v1544_v20, %v715_v13 }
 0x205   : > { %v788_v34 = vmax.f32 %v719_v31, 0.0 }
 0x206   : > { %v787_v23 = vmax.f32 %v716_v21, 0.0 }
 0x209   : > { %v976_v25 = vpop.f32.mrf.mxu1 }
 0x20a   : > { %v977_v26 = vadd.f32 %v1591_v28, %v976_v25 }
 0x20c   : > { %1091 = vst [vmem:[%s1596_s28 + $0xf0] sm:$0xff] %v977_v26  ;;  %1015 = vmatmul.bf16.gmra.mxu2 %v815_v27  ;;  %v821_v26 = vpack.c.bf16 %v787_v23, %v786_v22  ;;  %v720_v27 = vpop.f32.mrf.mxu3 }
 0x20d   : > { %v721_v32 = vadd.f32 %v1544_v20, %v720_v27 }
 0x20f   : > { %v789_v35 = vmax.f32 %v721_v32, 0.0 }
 0x211   : > { %v978_v29 = vpop.f32.mrf.mxu1 }
 0x212   : > { %v979_v33 = vadd.f32 %v1591_v28, %v978_v29 }
 0x214   : > { %1092 = vst [vmem:[%s1596_s28 + $0xf8] sm:$0xff] %v979_v33  ;;  %v723_v33 = vpop.f32.mrf.mxu3 }
 0x215   : > { %v724_v42 = vadd.f32 %v1544_v20, %v723_v33 }
 0x217   : > { %v790_v44 = vmax.f32 %v724_v42, 0.0 }
 0x21c   : > { %1020 = vmatmul.bf16.gmra.mxu2 %v816_v36 }
 0x21f   : > { %v981_v38 = vpop.f32.mrf.mxu2 }
 0x220   : > { %v982_v39 = vadd.f32 %v1591_v28, %v981_v38  ;;  %v822_v38 = vpack.c.bf16 %v789_v35, %v788_v34 }
 0x222   : > { %1093 = vst [vmem:[%s1596_s28 + $0x100] sm:$0xff] %v982_v39  ;;  %v725_v39 = vpop.f32.mrf.mxu3 }
 0x223   : > { %v726_v43 = vadd.f32 %v1544_v20, %v725_v39 }
 0x227   : > { %v983_v45 = vpop.f32.mrf.mxu2 }
 0x228   : > { %v984_v46 = vadd.f32 %v1591_v28, %v983_v45  ;;  %v791_v45 = vmax.f32 %v726_v43, 0.0 }
 0x22a   : > { %1094 = vst [vmem:[%s1596_s28 + $0x108] sm:$0xff] %v984_v46 }
 0x22c   : > { %1025 = vmatmul.bf16.gmra.mxu2 %v817_v47 }
 0x22f   : > { %v986_v48 = vpop.f32.mrf.mxu2 }
 0x230   : > { %v987_v50 = vadd.f32 %v1591_v28, %v986_v48  ;;  %v823_v48 = vpack.c.bf16 %v791_v45, %v790_v44 }
 0x232   : > { %1095 = vst [vmem:[%s1596_s28 + $0x110] sm:$0xff] %v987_v50 }
 0x237   : > { %v988_v55 = vpop.f32.mrf.mxu2 }
 0x238   : > { %v989_v56 = vadd.f32 %v1591_v28, %v988_v55 }
 0x23a   : > { %1096 = vst [vmem:[%s1596_s28 + $0x118] sm:$0xff] %v989_v56 }
 0x23c   : > { %1030 = vmatmul.bf16.gmra.mxu2 %v818_v58 }
 0x23f   : > { %v991_v59 = vpop.f32.mrf.mxu2 }
 0x240   : > { %v992_v60 = vadd.f32 %v1591_v28, %v991_v59 }
 0x242   : > { %1097 = vst [vmem:[%s1596_s28 + $0x120] sm:$0xff] %v992_v60 }
 0x247   : > { %v993_v2 = vpop.f32.mrf.mxu2 }
 0x248   : > { %v994_v3 = vadd.f32 %v1591_v28, %v993_v2 }
 0x24a   : > { %1098 = vst [vmem:[%s1596_s28 + $0x128] sm:$0xff] %v994_v3 }
 0x24c   : > { %1035 = vmatmul.bf16.gmra.mxu2 %v819_v4 }
 0x24f   : > { %v996_v6 = vpop.f32.mrf.mxu2 }
 0x250   : > { %v997_v7 = vadd.f32 %v1591_v28, %v996_v6 }
 0x252   : > { %1099 = vst [vmem:[%s1596_s28 + $0x130] sm:$0xff] %v997_v7 }
 0x257   : > { %v998_v12 = vpop.f32.mrf.mxu2 }
 0x258   : > { %v999_v14 = vadd.f32 %v1591_v28, %v998_v12 }
 0x25a   : > { %1100 = vst [vmem:[%s1596_s28 + $0x138] sm:$0xff] %v999_v14 }
 0x25c   : > { %1040 = vmatmul.bf16.gmra.mxu2 %v820_v15 }
 0x25f   : > { %v1001_v16 = vpop.f32.mrf.mxu2 }
 0x260   : > { %v1002_v17 = vadd.f32 %v1591_v28, %v1001_v16 }
 0x262   : > { %1101 = vst [vmem:[%s1596_s28 + $0x140] sm:$0xff] %v1002_v17 }
 0x267   : > { %v1003_v24 = vpop.f32.mrf.mxu2 }
 0x268   : > { %v1004_v25 = vadd.f32 %v1591_v28, %v1003_v24 }
 0x26a   : > { %1102 = vst [vmem:[%s1596_s28 + $0x148] sm:$0xff] %v1004_v25 }
 0x26c   : > { %1045 = vmatmul.bf16.gmra.mxu2 %v821_v26 }
 0x26f   : > { %v1006_v29 = vpop.f32.mrf.mxu2 }
 0x270   : > { %v1007_v30 = vadd.f32 %v1591_v28, %v1006_v29 }
 0x272   : > { %1103 = vst [vmem:[%s1596_s28 + $0x150] sm:$0xff] %v1007_v30 }
 0x277   : > { %v1008_v36 = vpop.f32.mrf.mxu2 }
 0x278   : > { %v1009_v37 = vadd.f32 %v1591_v28, %v1008_v36 }
 0x27a   : > { %1104 = vst [vmem:[%s1596_s28 + $0x158] sm:$0xff] %v1009_v37 }
 0x27c   : > { %1050 = vmatmul.bf16.gmra.mxu2 %v822_v38 }
 0x27f   : > { %v1011_v40 = vpop.f32.mrf.mxu2 }
 0x280   : > { %v1012_v41 = vadd.f32 %v1591_v28, %v1011_v40 }
 0x282   : > { %1105 = vst [vmem:[%s1596_s28 + $0x160] sm:$0xff] %v1012_v41 }
 0x287   : > { %v1013_v46 = vpop.f32.mrf.mxu2 }
 0x288   : > { %v1014_v47 = vadd.f32 %v1591_v28, %v1013_v46 }
 0x28a   : > { %1106 = vst [vmem:[%s1596_s28 + $0x168] sm:$0xff] %v1014_v47 }
 0x28c   : > { %1055 = vmatmul.bf16.gmra.mxu2 %v823_v48 }
 0x28f   : > { %v1016_v49 = vpop.f32.mrf.mxu2 }
 0x290   : > { %v1017_v50 = vadd.f32 %v1591_v28, %v1016_v49 }
 0x292   : > { %1107 = vst [vmem:[%s1596_s28 + $0x170] sm:$0xff] %v1017_v50 }
 0x297   : > { %v1018_v51 = vpop.f32.mrf.mxu2 }
 0x298   : > { %v1019_v20 = vadd.f32 %v1591_v28, %v1018_v51 }
 0x29a   : > { %1108 = vst [vmem:[%s1596_s28 + $0x178] sm:$0xff] %v1019_v20 }
 0x29f   : > { %v1021_v52 = vpop.f32.mrf.mxu2 }
 0x2a0   : > { %v1022_v53 = vadd.f32 %v1591_v28, %v1021_v52 }
 0x2a2   : > { %1109 = vst [vmem:[%s1596_s28 + $0x180] sm:$0xff] %v1022_v53 }
 0x2a7   : > { %v1023_v54 = vpop.f32.mrf.mxu2 }
 0x2a8   : > { %v1024_v55 = vadd.f32 %v1591_v28, %v1023_v54 }
 0x2aa   : > { %1110 = vst [vmem:[%s1596_s28 + $0x188] sm:$0xff] %v1024_v55 }
 0x2af   : > { %v1026_v56 = vpop.f32.mrf.mxu2 }
 0x2b0   : > { %v1027_v57 = vadd.f32 %v1591_v28, %v1026_v56 }
 0x2b2   : > { %1111 = vst [vmem:[%s1596_s28 + $0x190] sm:$0xff] %v1027_v57 }
 0x2b7   : > { %v1028_v58 = vpop.f32.mrf.mxu2 }
 0x2b8   : > { %v1029_v59 = vadd.f32 %v1591_v28, %v1028_v58 }
 0x2ba   : > { %1112 = vst [vmem:[%s1596_s28 + $0x198] sm:$0xff] %v1029_v59 }
 0x2bf   : > { %v1031_v60 = vpop.f32.mrf.mxu2 }
 0x2c0   : > { %v1032_v61 = vadd.f32 %v1591_v28, %v1031_v60 }
 0x2c2   : > { %1113 = vst [vmem:[%s1596_s28 + $0x1a0] sm:$0xff] %v1032_v61 }
 0x2c7   : > { %v1033_v62 = vpop.f32.mrf.mxu2 }
 0x2c8   : > { %v1034_v63 = vadd.f32 %v1591_v28, %v1033_v62 }
 0x2ca   : > { %1114 = vst [vmem:[%s1596_s28 + $0x1a8] sm:$0xff] %v1034_v63 }
 0x2cf   : > { %v1036_v0 = vpop.f32.mrf.mxu2 }
 0x2d0   : > { %v1037_v1 = vadd.f32 %v1591_v28, %v1036_v0 }
 0x2d2   : > { %1115 = vst [vmem:[%s1596_s28 + $0x1b0] sm:$0xff] %v1037_v1 }
 0x2d7   : > { %v1038_v2 = vpop.f32.mrf.mxu2 }
 0x2d8   : > { %v1039_v3 = vadd.f32 %v1591_v28, %v1038_v2 }
 0x2da   : > { %1116 = vst [vmem:[%s1596_s28 + $0x1b8] sm:$0xff] %v1039_v3 }
 0x2df   : > { %v1041_v4 = vpop.f32.mrf.mxu2 }
 0x2e0   : > { %v1042_v5 = vadd.f32 %v1591_v28, %v1041_v4 }
 0x2e2   : > { %1117 = vst [vmem:[%s1596_s28 + $0x1c0] sm:$0xff] %v1042_v5 }
 0x2e7   : > { %v1043_v6 = vpop.f32.mrf.mxu2 }
 0x2e8   : > { %v1044_v7 = vadd.f32 %v1591_v28, %v1043_v6 }
 0x2ea   : > { %1118 = vst [vmem:[%s1596_s28 + $0x1c8] sm:$0xff] %v1044_v7 }
 0x2ef   : > { %v1046_v8 = vpop.f32.mrf.mxu2 }
 0x2f0   : > { %v1047_v9 = vadd.f32 %v1591_v28, %v1046_v8 }
 0x2f2   : > { %1119 = vst [vmem:[%s1596_s28 + $0x1d0] sm:$0xff] %v1047_v9 }
 0x2f7   : > { %v1048_v10 = vpop.f32.mrf.mxu2 }
 0x2f8   : > { %v1049_v11 = vadd.f32 %v1591_v28, %v1048_v10 }
 0x2fa   : > { %1120 = vst [vmem:[%s1596_s28 + $0x1d8] sm:$0xff] %v1049_v11 }
 0x2ff   : > { %v1051_v12 = vpop.f32.mrf.mxu2 }
 0x300   : > { %v1052_v13 = vadd.f32 %v1591_v28, %v1051_v12 }
 0x302   : > { %1121 = vst [vmem:[%s1596_s28 + $0x1e0] sm:$0xff] %v1052_v13 }
 0x307   : > { %v1053_v14 = vpop.f32.mrf.mxu2 }
 0x308   : > { %v1054_v15 = vadd.f32 %v1591_v28, %v1053_v14 }
 0x30a   : > { %1122 = vst [vmem:[%s1596_s28 + $0x1e8] sm:$0xff] %v1054_v15 }
 0x30f   : > { %v1056_v16 = vpop.f32.mrf.mxu2 }
 0x310   : > { %v1057_v17 = vadd.f32 %v1591_v28, %v1056_v16 }
 0x312   : > { %1123 = vst [vmem:[%s1596_s28 + $0x1f0] sm:$0xff] %v1057_v17 }
 0x317   : > { %v1058_v18 = vpop.f32.mrf.mxu2 }
 0x318   : > { %v1059_v19 = vadd.f32 %v1591_v28, %v1058_v18 }
 0x31a   : > { %1124 = vst [vmem:[%s1596_s28 + $0x1f8] sm:$0xff] %v1059_v19 }
 0x31b PF: > { %s15_s18 = sadd.s32 1, %s1449_s18  }
 0x31c   : > { %p12_p4 = scmp.ge.s32.totalorder %s15_s18, 6  }
 0x31e   :  { %14 = sbr.rel (!%p12_p4) target bundleno = 1 (0x1), region = 70 }

</bundles_post_ra>
